<compile_context>
chip_gen: v7x
topology: tpu7x:2x2x1
jax: 0.10.0
libtpu: 0.0.40
codegen_flags: <defaults>
</compile_context>

<pallas_src>
import math

import jax
import jax.numpy as jnp
from jax.experimental import pallas as pl
from jax.experimental.pallas import tpu as pltpu


# ----------------------------------------------------------------------------
# Kernel 1: fused Linear projection + head split (runs once per (batch, L tile))
# ----------------------------------------------------------------------------
def make_proj_kernel(num_heads: int, d_k: int, mm_dtype):
    def proj_kernel(x_ref, w_ref, b_ref, out_ref):
        # x_ref: [TL, E] f32, w_ref: [E, E] mm_dtype (pre-transposed [in, out]),
        # b_ref: [1, E] f32, out_ref: [H, TL, d_k] mm_dtype
        x = x_ref[...].astype(mm_dtype)                               # one cast
        y = jnp.dot(x, w_ref[...],
                    preferred_element_type=jnp.float32) + b_ref[...]  # [TL, E]
        # Head split at store time: the matmul above is a single full-E
        # lane-dense contraction; the static lane slices below go straight to
        # the output ref (no jnp.stack copy).  Lane-dense whenever d_k % 128
        # == 0 (production shapes).
        for h in range(num_heads):
            out_ref[h] = y[:, h * d_k:(h + 1) * d_k].astype(out_ref.dtype)

    return proj_kernel


# ----------------------------------------------------------------------------
# Kernel 2: flash-style attention + fused output projection
# ----------------------------------------------------------------------------
def make_attn_kernel(num_heads: int, d_k: int, mm_dtype):
    # Exact reciprocal in the f32 parity mode; approximate EUP reciprocal
    # (free bundle slot) in the bf16 perf mode where it is far below noise.
    use_approx_recip = jnp.dtype(mm_dtype) != jnp.dtype(jnp.float32)

    def attn_kernel(q_ref, k_ref, v_ref, wo_ref, bo_ref, out_ref,
                    m_sc, l_sc, acc_sc, vsum_sc):
        # q_ref: [H, TQ, dk] (pre-scaled by 1/sqrt(dk)), k_ref/v_ref: [H, TK, dk]
        # wo_ref: [H, dk, E], bo_ref: [1, E] f32, out_ref: [TQ, E]
        kv = pl.program_id(2)

        @pl.when(kv == 0)
        def _():
            m_sc[...] = jnp.full_like(m_sc, -jnp.inf)
            l_sc[...] = jnp.zeros_like(l_sc)
            acc_sc[...] = jnp.zeros_like(acc_sc)
            vsum_sc[...] = jnp.zeros_like(vsum_sc)

        k = k_ref[...]
        v = v_ref[...]
        # Head-batched QK^T; f32 accumulation, f32 softmax numerics.
        s = jnp.einsum('hqd,hkd->hqk', q_ref[...], k,
                       preferred_element_type=jnp.float32)        # [H, TQ, TK]

        m_prev = m_sc[...]
        m_new = jnp.maximum(m_prev, jnp.max(s, axis=-1, keepdims=True))
        alpha = jnp.exp(m_prev - m_new)
        p = jnp.exp(s - m_new)
        l_sc[...] = alpha * l_sc[...] + jnp.sum(p, axis=-1, keepdims=True)
        acc_sc[...] = alpha * acc_sc[...] + jnp.einsum(
            'hqk,hkd->hqd', p.astype(mm_dtype), v,
            preferred_element_type=jnp.float32)                   # [H, TQ, dk]
        m_sc[...] = m_new
        # Running sum_k V: reproduces the reference's "+ 1e-12" that is added
        # to the probabilities *before* P @ V (ctx += 1e-12 * sum_k V).
        vsum_sc[...] += jnp.sum(v.astype(jnp.float32), axis=1, keepdims=True)

        @pl.when(kv == pl.num_programs(2) - 1)
        def _():
            inv_l = pl.reciprocal(l_sc[...], approx=use_approx_recip)
            ctx = acc_sc[...] * inv_l + 1e-12 * vsum_sc[...]      # [H, TQ, dk]
            ctx_mm = ctx.astype(mm_dtype)                         # one cast
            wo = wo_ref[...]
            tq = ctx.shape[1]
            e_out = wo.shape[-1]
            # Output projection fused with the head reduction: per-head
            # [TQ,dk]@[dk,E] dots accumulated into a single f32 value (no
            # [H, TQ, E] intermediate, no separate jnp.sum pass).
            out = jnp.zeros((tq, e_out), jnp.float32)
            for h in range(num_heads):
                out = out + jnp.dot(ctx_mm[h], wo[h],
                                    preferred_element_type=jnp.float32)
            out_ref[...] = (out + bo_ref[...]).astype(out_ref.dtype)

    return attn_kernel


# ----------------------------------------------------------------------------
# Wrapper helpers
# ----------------------------------------------------------------------------
def _pick_tile(n, target):
    """Largest divisor of n that is <= target and a multiple of 8 (else n)."""
    if n <= target:
        return n
    for t in range(target, 7, -1):
        if n % t == 0 and t % 8 == 0:
            return t
    return n


def _const_spec(arr, n_grid_axes):
    """Constant-block-index spec for weights/biases: fetched once, single
    buffer (no pointless double-buffering of weight VMEM)."""
    nd = arr.ndim
    if n_grid_axes == 2:
        imap = lambda g0, g1: (0,) * nd
    else:
        imap = lambda g0, g1, g2: (0,) * nd
    return pl.BlockSpec(arr.shape, imap, pipeline_mode=pl.Buffered(1))


def _vmem_limit_bytes():
    try:
        cap = pltpu.get_tpu_info().vmem_capacity_bytes
    except Exception:
        cap = 128 * 1024 * 1024
    # ~75% of physical, capped: 96 MiB on v5e/v6e (128 MiB VMEM), 48 MiB on a
    # v7x TensorCore (64 MiB) -- re-derived per generation instead of a fixed
    # number tuned against 128 MiB.
    return min(int(cap * 3 // 4), 100 * 1024 * 1024)


def _project(x, w_t, b, *, num_heads, d_k, mm_dtype, tile_l, vmem_limit):
    """Hoisted Q/K/V projection: [B, L, E] -> [B, H, L, d_k] in mm_dtype."""
    B, L, E = x.shape
    TL = _pick_tile(L, tile_l)
    n_l = L // TL
    mm_isz = jnp.dtype(mm_dtype).itemsize
    flops = 2 * B * L * E * E
    bytes_accessed = 4 * x.size + mm_isz * (w_t.size + B * L * E) + 4 * b.size
    return pl.pallas_call(
        make_proj_kernel(num_heads, d_k, mm_dtype),
        out_shape=jax.ShapeDtypeStruct((B, num_heads, L, d_k), mm_dtype),
        grid_spec=pltpu.PrefetchScalarGridSpec(
            num_scalar_prefetch=0,
            grid=(B, n_l),
            in_specs=[
                pl.BlockSpec((pl.Squeezed(), TL, E), lambda bi, li: (bi, li, 0)),
                _const_spec(w_t, 2),
                _const_spec(b, 2),
            ],
            out_specs=pl.BlockSpec((pl.Squeezed(), num_heads, TL, d_k),
                                   lambda bi, li: (bi, 0, li, 0)),
        ),
        compiler_params=pltpu.CompilerParams(
            dimension_semantics=("parallel", "parallel"),
            vmem_limit_bytes=vmem_limit),
        cost_estimate=pl.CostEstimate(flops=int(flops), transcendentals=0,
                                      bytes_accessed=int(bytes_accessed)),
    )(x, w_t, b)


def multi_head_attention(query, key, value, params, *, num_heads,
                         mm_dtype=jnp.bfloat16, tile_q=256, tile_l=512,
                         block_k=512):
    """query/key/value: [B, L, E] float32.  params: PyTorch-layout weights."""
    if key is None:
        key = query
    if value is None:
        value = query
    B, Lq, E = query.shape
    Lk = key.shape[1]
    Lv = value.shape[1]
    assert E % num_heads == 0
    assert Lk == Lv, "key and value must have the same sequence length"
    d_k = E // num_heads
    scale = 1.0 / math.sqrt(d_k)
    f32 = jnp.float32

    # PyTorch Linear stores W as [out, in]; pre-transpose ONCE to [in, out].
    # The 1/sqrt(d_k) scale is folded into W_q / b_q (free).
    wq_t = (params["wq"].T.astype(f32) * scale).astype(mm_dtype)       # [E, E]
    wk_t = params["wk"].T.astype(mm_dtype)
    wv_t = params["wv"].T.astype(mm_dtype)
    wo_h = params["wo"].T.reshape(num_heads, d_k, E).astype(mm_dtype)  # [H,dk,E]
    bq = params["bq"].reshape(1, E).astype(f32) * scale
    bk = params["bk"].reshape(1, E).astype(f32)
    bv = params["bv"].reshape(1, E).astype(f32)
    bo = params["bo"].reshape(1, E).astype(f32)

    vmem_limit = _vmem_limit_bytes()

    # ---- Q/K/V projections: hoisted out of the attention grid (computed once
    #      per sequence, emitted directly in the MXU dtype, pre-split by head).
    qh = _project(query, wq_t, bq, num_heads=num_heads, d_k=d_k,
                  mm_dtype=mm_dtype, tile_l=tile_l, vmem_limit=vmem_limit)
    kh = _project(key, wk_t, bk, num_heads=num_heads, d_k=d_k,
                  mm_dtype=mm_dtype, tile_l=tile_l, vmem_limit=vmem_limit)
    vh = _project(value, wv_t, bv, num_heads=num_heads, d_k=d_k,
                  mm_dtype=mm_dtype, tile_l=tile_l, vmem_limit=vmem_limit)

    # ---- Attention tiling.
    TQ = _pick_tile(Lq, tile_q)
    n_q = Lq // TQ
    if B * n_q < 2 and Lq % 2 == 0 and (Lq // 2) % 8 == 0:
        # v7x has 2 TensorCores: keep the parallel grid extent >= 2.
        TQ = Lq // 2
        n_q = 2
    TK = _pick_tile(Lk, block_k)
    n_k = Lk // TK

    mm_isz = jnp.dtype(mm_dtype).itemsize
    flops = B * (4 * Lq * Lk * E + 2 * Lq * E * E)
    transcendentals = B * num_heads * Lq * Lk
    bytes_accessed = (mm_isz * (qh.size + (kh.size + vh.size) * n_q + wo_h.size)
                      + 4 * (bo.size + B * Lq * E))

    return pl.pallas_call(
        make_attn_kernel(num_heads, d_k, mm_dtype),
        out_shape=jax.ShapeDtypeStruct((B, Lq, E), query.dtype),
        grid_spec=pltpu.PrefetchScalarGridSpec(
            num_scalar_prefetch=0,
            grid=(B, n_q, n_k),
            in_specs=[
                pl.BlockSpec((pl.Squeezed(), num_heads, TQ, d_k),
                             lambda bi, qi, ki: (bi, 0, qi, 0)),
                pl.BlockSpec((pl.Squeezed(), num_heads, TK, d_k),
                             lambda bi, qi, ki: (bi, 0, ki, 0)),
                pl.BlockSpec((pl.Squeezed(), num_heads, TK, d_k),
                             lambda bi, qi, ki: (bi, 0, ki, 0)),
                _const_spec(wo_h, 3),
                _const_spec(bo, 3),
            ],
            out_specs=pl.BlockSpec((pl.Squeezed(), TQ, E),
                                   lambda bi, qi, ki: (bi, qi, 0)),
            scratch_shapes=[
                pltpu.VMEM((num_heads, TQ, 1), jnp.float32),    # running max m
                pltpu.VMEM((num_heads, TQ, 1), jnp.float32),    # running denom l
                pltpu.VMEM((num_heads, TQ, d_k), jnp.float32),  # running P@V acc
                pltpu.VMEM((num_heads, 1, d_k), jnp.float32),   # running sum_k V
            ],
        ),
        compiler_params=pltpu.CompilerParams(
            dimension_semantics=("parallel", "parallel", "arbitrary"),
            vmem_limit_bytes=vmem_limit),
        cost_estimate=pl.CostEstimate(flops=int(flops),
                                      transcendentals=int(transcendentals),
                                      bytes_accessed=int(bytes_accessed)),
    )(qh, kh, vh, wo_h, bo)


# ----------------------------------------------------------------------------
# Plain-JAX reference mirroring the PyTorch forward (sanity check)
# ----------------------------------------------------------------------------
def reference_mha(query, key, value, params, *, num_heads):
    B, Lq, E = query.shape
    d_k = E // num_heads

    def lin(x, w, b):
        return x @ w.T + b

    Q = lin(query, params["wq"], params["bq"]).reshape(B, Lq, num_heads, d_k).transpose(0, 2, 1, 3)
    K = lin(key, params["wk"], params["bk"]).reshape(B, -1, num_heads, d_k).transpose(0, 2, 1, 3)
    V = lin(value, params["wv"], params["bv"]).reshape(B, -1, num_heads, d_k).transpose(0, 2, 1, 3)

    s = jnp.einsum("bhqd,bhkd->bhqk", Q, K) / math.sqrt(d_k)
    p = jax.nn.softmax(s, axis=-1) + 1e-12
    ctx = jnp.einsum("bhqk,bhkd->bhqd", p, V).transpose(0, 2, 1, 3).reshape(B, Lq, E)
    return lin(ctx, params["wo"], params["bo"])


if __name__ == "__main__":
    # NOTE: demo shapes (E=32, d_k=8) are deliberately tiny and NOT
    # representative for performance (production wants E % 128 == 0, d_k>=128).
    B, L, E, H = 2, 8, 32, 4

    key0 = jax.random.PRNGKey(0)
    ks = jax.random.split(key0, 12)

    def init_linear(kw, kb, fan_in):
        bound = 1.0 / math.sqrt(fan_in)
        w = jax.random.uniform(kw, (E, E), jnp.float32, -bound, bound)
        b = jax.random.uniform(kb, (1, E), jnp.float32, -bound, bound)
        return w, b

    wq, bq = init_linear(ks[0], ks[1], E)
    wk, bk = init_linear(ks[2], ks[3], E)
    wv, bv = init_linear(ks[4], ks[5], E)
    wo, bo = init_linear(ks[6], ks[7], E)
    params = dict(wq=wq, bq=bq, wk=wk, bk=bk, wv=wv, bv=bv, wo=wo, bo=bo)

    query = jax.random.normal(ks[8], (B, L, E), jnp.float32)
    key_in = jax.random.normal(ks[9], (B, L, E), jnp.float32)
    value_in = jax.random.normal(ks[10], (B, L, E), jnp.float32)

    ref = reference_mha(query, key_in, value_in, params, num_heads=H)

    # Full-precision parity run (matches the f32 PyTorch module).
    out_f32 = multi_head_attention(query, key_in, value_in, params,
                                   num_heads=H, mm_dtype=jnp.float32)
    out_f32 = jax.block_until_ready(out_f32)
    assert out_f32.shape == (B, L, E)
    assert jnp.allclose(out_f32, ref, atol=1e-4, rtol=1e-4), \
        "f32 kernel mismatch vs reference"

    # Default bf16-MXU-operand run (perf configuration; softmax stays f32).
    out_bf16 = multi_head_attention(query, key_in, value_in, params, num_heads=H)
    out_bf16 = jax.block_until_ready(out_bf16)
    assert out_bf16.shape == (B, L, E)
    assert jnp.allclose(out_bf16, ref, atol=5e-2, rtol=5e-2), \
        "bf16 kernel mismatch vs reference"

    print("KERNEL_OK")
</pallas_src>

<mosaic_0001>
module attributes {stable_mosaic.version = 11 : i64} {
  func.func @proj_kernel(%arg0: i32, %arg1: i32, %arg2: memref<1x8x32xf32, #tpu.memory_space<vmem>>, %arg3: memref<32x32xf32, #tpu.memory_space<vmem>>, %arg4: memref<1x32xf32, #tpu.memory_space<vmem>>, %arg5: memref<1x4x8x8xf32, #tpu.memory_space<vmem>>) attributes {dimension_semantics = [#tpu.dimension_semantics<parallel>, #tpu.dimension_semantics<parallel>], iteration_bounds = array<i64: 2, 1>, scalar_prefetch = 0 : i64, scratch_operands = 0 : i64, tpu.core_type = #tpu.core_type<tc>, window_params = [{transform_indices = @transform_0, window_bounds = array<i64: 1, 8, 32>}, {pipeline_mode = #tpu.pipeline_mode<synchronous>, transform_indices = @transform_1, window_bounds = array<i64: 32, 32>}, {pipeline_mode = #tpu.pipeline_mode<synchronous>, transform_indices = @transform_2, window_bounds = array<i64: 1, 32>}, {transform_indices = @transform_3, window_bounds = array<i64: 1, 4, 8, 8>}]} {
    %c0 = arith.constant 0 : index
    %c0_0 = arith.constant 0 : index
    %c0_1 = arith.constant 0 : index
    %0 = vector.load %arg2[%c0, %c0_0, %c0_1] : memref<1x8x32xf32, #tpu.memory_space<vmem>>, vector<1x8x32xf32>
    %1 = vector.shape_cast %0 : vector<1x8x32xf32> to vector<8x32xf32>
    %c0_2 = arith.constant 0 : index
    %c0_3 = arith.constant 0 : index
    %2 = vector.load %arg3[%c0_2, %c0_3] : memref<32x32xf32, #tpu.memory_space<vmem>>, vector<32x32xf32>
    %cst = arith.constant dense<0.000000e+00> : vector<8x32xf32>
    %3 = tpu.matmul %1, %2, %cst {dimension_numbers = #tpu.dot_dimension_numbers<[1], [0], [0], [1], [0, 0, 1, 1], [], []>} : vector<8x32xf32>, vector<32x32xf32>, vector<8x32xf32> -> vector<8x32xf32>
    %c0_4 = arith.constant 0 : index
    %c0_5 = arith.constant 0 : index
    %4 = vector.load %arg4[%c0_4, %c0_5] : memref<1x32xf32, #tpu.memory_space<vmem>>, vector<1x32xf32>
    %5 = vector.broadcast %4 : vector<1x32xf32> to vector<8x32xf32>
    %6 = arith.addf %3, %5 : vector<8x32xf32>
    %7 = vector.extract_strided_slice %6 {offsets = [0, 0], sizes = [8, 8], strides = [1, 1]} : vector<8x32xf32> to vector<8x8xf32>
    %c0_6 = arith.constant 0 : index
    %c0_7 = arith.constant 0 : index
    %c0_8 = arith.constant 0 : index
    %c0_9 = arith.constant 0 : index
    %8 = vector.load %arg5[%c0_6, %c0_7, %c0_8, %c0_9] : memref<1x4x8x8xf32, #tpu.memory_space<vmem>>, vector<1x1x8x8xf32>
    %9 = vector.shape_cast %8 : vector<1x1x8x8xf32> to vector<8x8xf32>
    %10 = vector.shape_cast %7 : vector<8x8xf32> to vector<1x1x8x8xf32>
    tpu.vector_store %arg5[%c0_6, %c0_7, %c0_8, %c0_9], %10 {strides = array<i32>} : memref<1x4x8x8xf32, #tpu.memory_space<vmem>>, vector<1x1x8x8xf32>,
    %11 = vector.extract_strided_slice %6 {offsets = [0, 8], sizes = [8, 8], strides = [1, 1]} : vector<8x32xf32> to vector<8x8xf32>
    %c0_10 = arith.constant 0 : index
    %c1 = arith.constant 1 : index
    %c0_11 = arith.constant 0 : index
    %c0_12 = arith.constant 0 : index
    %12 = vector.load %arg5[%c0_10, %c1, %c0_11, %c0_12] : memref<1x4x8x8xf32, #tpu.memory_space<vmem>>, vector<1x1x8x8xf32>
    %13 = vector.shape_cast %12 : vector<1x1x8x8xf32> to vector<8x8xf32>
    %14 = vector.shape_cast %11 : vector<8x8xf32> to vector<1x1x8x8xf32>
    tpu.vector_store %arg5[%c0_10, %c1, %c0_11, %c0_12], %14 {strides = array<i32>} : memref<1x4x8x8xf32, #tpu.memory_space<vmem>>, vector<1x1x8x8xf32>,
    %15 = vector.extract_strided_slice %6 {offsets = [0, 16], sizes = [8, 8], strides = [1, 1]} : vector<8x32xf32> to vector<8x8xf32>
    %c0_13 = arith.constant 0 : index
    %c2 = arith.constant 2 : index
    %c0_14 = arith.constant 0 : index
    %c0_15 = arith.constant 0 : index
    %16 = vector.load %arg5[%c0_13, %c2, %c0_14, %c0_15] : memref<1x4x8x8xf32, #tpu.memory_space<vmem>>, vector<1x1x8x8xf32>
    %17 = vector.shape_cast %16 : vector<1x1x8x8xf32> to vector<8x8xf32>
    %18 = vector.shape_cast %15 : vector<8x8xf32> to vector<1x1x8x8xf32>
    tpu.vector_store %arg5[%c0_13, %c2, %c0_14, %c0_15], %18 {strides = array<i32>} : memref<1x4x8x8xf32, #tpu.memory_space<vmem>>, vector<1x1x8x8xf32>,
    %19 = vector.extract_strided_slice %6 {offsets = [0, 24], sizes = [8, 8], strides = [1, 1]} : vector<8x32xf32> to vector<8x8xf32>
    %c0_16 = arith.constant 0 : index
    %c3 = arith.constant 3 : index
    %c0_17 = arith.constant 0 : index
    %c0_18 = arith.constant 0 : index
    %20 = vector.load %arg5[%c0_16, %c3, %c0_17, %c0_18] : memref<1x4x8x8xf32, #tpu.memory_space<vmem>>, vector<1x1x8x8xf32>
    %21 = vector.shape_cast %20 : vector<1x1x8x8xf32> to vector<8x8xf32>
    %22 = vector.shape_cast %19 : vector<8x8xf32> to vector<1x1x8x8xf32>
    tpu.vector_store %arg5[%c0_16, %c3, %c0_17, %c0_18], %22 {strides = array<i32>} : memref<1x4x8x8xf32, #tpu.memory_space<vmem>>, vector<1x1x8x8xf32>,
    return
  }
  func.func @transform_0(%arg0: i32, %arg1: i32) -> (i32, i32, i32) {
    %c0_i32 = arith.constant 0 : i32
    %c0_i32_0 = arith.constant 0 : i32
    return %arg0, %arg1, %c0_i32 : i32, i32, i32
  }
  func.func @transform_1(%arg0: i32, %arg1: i32) -> (i32, i32) {
    %c0_i32 = arith.constant 0 : i32
    %c0_i32_0 = arith.constant 0 : i32
    %c0_i32_1 = arith.constant 0 : i32
    return %c0_i32, %c0_i32_0 : i32, i32
  }
  func.func @transform_2(%arg0: i32, %arg1: i32) -> (i32, i32) {
    %c0_i32 = arith.constant 0 : i32
    %c0_i32_0 = arith.constant 0 : i32
    %c0_i32_1 = arith.constant 0 : i32
    return %c0_i32, %c0_i32_0 : i32, i32
  }
  func.func @transform_3(%arg0: i32, %arg1: i32) -> (i32, i32, i32, i32) {
    %c0_i32 = arith.constant 0 : i32
    %c0_i32_0 = arith.constant 0 : i32
    %c0_i32_1 = arith.constant 0 : i32
    return %arg0, %c0_i32, %arg1, %c0_i32_0 : i32, i32, i32, i32
  }
}

</mosaic_0001>

<bundles_post_ra>
// kernel: tpu_custom_call.1
= control target key start
LH: loop header
LB: loop body
LE: loop exit
PB: predicated region body
PF: predicated region fallthrough
CT: control target
= control target key end

     0   :  { %8 = vsyncpa [#allocation3], 0  ;;  %s1057_s0 = inlined_call_operand.hbm [shape: f32[2,8,32], index: 0, kind: input, shape index: {}]   ;;  %s1058_s1 = inlined_call_operand.hbm [shape: f32[32,32], index: 1, kind: input, shape index: {}]   ;;  %s1059_s2 = inlined_call_operand.hbm [shape: f32[1,32], index: 2, kind: input, shape index: {}]   ;;  %s1060_s3 = inlined_call_operand.hbm [shape: f32[2,4,8,8], index: 3, kind: output, shape index: {}]  }
   0x1   :  { %10 = vsyncpa [#allocation3 + $0x1], 0 }
   0x2   :  { %11 = vsyncpa [#allocation6], 0 }
   0x3   :  { %12 = vsyncpa [#allocation4], 0 }
   0x4   :  { %14 = vsyncpa [#allocation4 + $0x1], 0  ;;  %s799_s12 = smov 0   ;;  %s801_s13 = smov 0  }
   0x5   :  { %s803_s14 = smov 0   ;;  %s805_s15 = smov 0  }
   0x6   :  { %s807_s16 = smov 0   ;;  %s809_s17 = smov 0  }
   0x7 LB: > { %s452_s18 = sadd.s32 4294967295, %s763_s17   ;;  %s453_s19 = sadd.s32 4294967294, %s763_s17   ;;  %s763_s17 = sphi %s809_s17, %s20_s17   ;;  %s759_s16 = sphi %s807_s16, %s1082_s16   ;;  %s755_s15 = sphi %s805_s15, %s1081_s15   ;;  %s751_s14 = sphi %s803_s14, %s1080_s14   ;;  %s747_s13 = sphi %s801_s13, %s1079_s13   ;;  %s743_s12 = sphi %s799_s12, %s1078_s12  }
   0x8   : > { %p54_p0 = scmp.ne.s32.totalorder %s747_s13, %s743_s12  ;;  %p833_p1 = scmp.eq.s32.totalorder %s452_s18, 0 }
   0x9   : > { %p837_p2 = scmp.eq.s32.totalorder %s452_s18, 1  ;;  %p128_p3 = scmp.eq.s32.totalorder %s453_s19, 1 }
   0xa   : > { %s1065_s20 = scalar_select %p833_p1, 1, 0 }
   0xb   : > { %p843_p4 = por %p833_p1, %p54_p0  ;;  %p454_p5 = scmp.ge.s32.totalorder %s763_s17, 1 }
   0xc   : > { %p848_p6 = por %p128_p3, %p54_p0  ;;  %p135_p7 = scmp.lt.s32.totalorder %s763_s17, 3 }
   0xd   : > { %s1067_s22 = scalar_select %p843_p4, 1, 0 }
   0xe   : > { %s1068_s23 = scalar_select %p848_p6, 1, 0 }
   0xf   : > { %p853_p8 = pnand %p454_p5, %p135_p7  ;;  %s765_s25 = smov [#allocation5]  }
  0x10   : > { %s147_s26 = sshll.u32 %s765_s25, 4  ;;  %s766_s28 = smov [#allocation7]   ;;  %s857_s26 = int_to_ptr.vmem [resolvable:$true] %s147_s26 }
  0x11   : > { %p510_p9 = pneg %p853_p8  ;;  %s161_s29 = sshll.u32 %s766_s28, 4  ;;  %s868_s29 = int_to_ptr.vmem [resolvable:$true] %s161_s29 }
  0x12   : > { %s591_s5 = scalar_lea.hbm %s1058_s1, 512 }
  0x13   : > { %p864_p11 = pnand %p510_p9, %p833_p1  ;;  %p592_p12 = scmp.ne.s32.totalorder %s1058_s1, %s591_s5 }
  0x14   : > { %p598_p5 = scmp.lt.u32.totalorder %s591_s5, %s1058_s1 }
  0x15   : > { %p593_p13 = pneg %p864_p11 }
  0x17   : > { %p594_p0 = pnand %p593_p13, %p592_p12 }
  0x19   : > { %p595_p3 = pneg %p594_p0 }
  0x1b   : > { %p600_p7 = pnand %p598_p5, %p595_p3 }
  0x1d   : > { %603 = shalt.err (!%p600_p7)
}
  0x1e   : > { %s604_s10 = scalar_lea.vmem %s857_s26, 512  ;;  %p612_p1 = scmp.lt.s32.totalorder %s857_s26, %s857_s26 }
  0x1f   : > { %p605_p9 = scmp.ne.s32.totalorder %s857_s26, %s604_s10  ;;  %p613_p12 = scmp.lt.s32.totalorder %s604_s10, %s604_s10 }
  0x21   : > { %p607_p10 = pnand %p605_p9, %p593_p13  ;;  %p614_p0 = por %p613_p12, %p612_p1 }
  0x23   : > { %p608_p6 = pneg %p607_p10 }
  0x25   : > { %p615_p4 = pnand %p614_p0, %p608_p6 }
  0x27   : > { %618 = shalt.err (!%p615_p4)
}
  0x28   : > { %s767_s11 = smov 128   ;;  %s768_s18 = smov 8  }
  0x29   : > { %513 = dma.hbm_to_vmem [thread:$0]  (!%p864_p11), %s1058_s1, 512, %s857_s26, [#allocation6], %s767_s11, %s767_s11, %s768_s18  }
  0x2a   : > { %s619_s4 = scalar_lea.hbm %s1059_s2, 16 }
  0x2b   : > { %p620_p1 = scmp.ne.s32.totalorder %s1059_s2, %s619_s4  ;;  %p626_p10 = scmp.lt.u32.totalorder %s619_s4, %s1059_s2 }
  0x2d   : > { %p622_p4 = pnand %p620_p1, %p593_p13 }
  0x2f   : > { %p623_p6 = pneg %p622_p4 }
  0x31   : > { %p628_p3 = pnand %p626_p10, %p623_p6 }
  0x33   : > { %631 = shalt.err (!%p628_p3)
}
  0x34   : > { %s632_s26 = scalar_lea.vmem %s868_s29, 16  ;;  %s639_s9 = scalar_lea.vmem %s868_s29, 32 }
  0x35   : > { %p633_p5 = scmp.ne.s32.totalorder %s868_s29, %s632_s26  ;;  %p640_p12 = scmp.lt.s32.totalorder %s868_s29, %s868_s29 }
  0x36   : > { %p641_p0 = scmp.lt.s32.totalorder %s639_s9, %s632_s26 }
  0x37   : > { %p635_p7 = pnand %p633_p5, %p593_p13 }
  0x38   : > { %p642_p1 = por %p641_p0, %p640_p12 }
  0x39   : > { %p636_p9 = pneg %p635_p7 }
  0x3b   : > { %p643_p4 = pnand %p642_p1, %p636_p9 }
  0x3d   : > { %646 = shalt.err (!%p643_p4)
}
  0x3e   : > { %516 = dma.hbm_to_vmem [thread:$0]  (!%p864_p11), %s1059_s2, 16, %s868_s29, [#allocation6]  }
  0x3f   : > { %s32_s18 = sadd.s32 1, %s759_s16  ;;  %s41_s19 = sadd.s32 1, %s751_s14 }
  0x40   : > { %p34_p13 = scmp.ge.s32.totalorder %s32_s18, 2  ;;  %p48_p6 = scmp.ne.s32.totalorder %s751_s14, %s747_s13 }
  0x41   : > { %p49_p10 = scmp.eq.s32.totalorder %s763_s17, 0  ;;  %p527_p3 = scmp.lt.s32.totalorder %s763_s17, 2 }
  0x42   : > { %s1084_s18 = smov (%p34_p13, %s32_s18), 0  ;;  %p933_p7 = por %p837_p2, %p48_p6 }
  0x43   : > { %p50_p5 = por %p49_p10, %p48_p6  ;;  %s36_s25 = ssub.s32 %s759_s16, %s1084_s18 }
  0x44   : > { %s1071_s27 = scalar_select %p933_p7, 1, 0 }
  0x45   : > { %s172_s28 = sand.u32 1, %s751_s14   ;;  %p39_p9 = scmp.eq.s32.totalorder %s36_s25, 0 }
  0x46   : > { %s458_s29 = sshll.u32 %s172_s28, 3  ;;  %s459_s30 = sshll.u32 %s759_s16, 7 }
  0x47   : > { %s942_s4 = scalar_select %p39_p9, %s751_s14, %s41_s19  }
  0x48   : > { %s947_s7 = scalar_lea.hbm %s1057_s0, %s459_s30  ;;  %s176_s21 = scalar_lea.vmem [#allocation2], %s458_s29 }
  0x49   : > { %s184_s8 = sshll.u32 %s176_s21, 4  ;;  %p951_p2 = pnand %p527_p3, %p50_p5  ;;  %s955_s8 = int_to_ptr.vmem [resolvable:$true] %s184_s8 }
  0x4a   : > { %s173_s9 = scalar_lea.sflag [#allocation3], %s172_s28  ;;  %s647_s10 = scalar_lea.hbm %s947_s7, 128 }
  0x4b   : > { %p648_p11 = scmp.ne.s32.totalorder %s947_s7, %s647_s10  ;;  %p649_p12 = pneg %p951_p2 }
  0x4c   : > { %s652_s25 = scalar_lea.hbm %s1057_s0, 256  ;;  %p653_p4 = scmp.lt.u32.totalorder %s947_s7, %s1057_s0 }
  0x4d   : > { %p650_p0 = pnand %p649_p12, %p648_p11  ;;  %p654_p13 = scmp.lt.u32.totalorder %s652_s25, %s647_s10 }
  0x4e   : > { %p656_p10 = scmp.lt.u32.totalorder %s647_s10, %s947_s7 }
  0x4f   : > { %p651_p1 = pneg %p650_p0  ;;  %p655_p6 = por %p654_p13, %p653_p4 }
  0x51   : > { %p657_p3 = por %p656_p10, %p655_p6 }
  0x53   : > { %p658_p5 = pnand %p657_p3, %p651_p1 }
  0x55   : > { %661 = shalt.err (!%p658_p5)
}
  0x56   : > { %s662_s28 = scalar_lea.vmem %s955_s8, 128  ;;  %s769_s5 = smov [#allocation2]  }
  0x57   : > { %p663_p9 = scmp.ne.s32.totalorder %s955_s8, %s662_s28  ;;  %s667_s6 = sshll.u32 %s769_s5, 4  ;;  %s668_s6 = int_to_ptr.vmem [resolvable:$false] %s667_s6 }
  0x58   : > { %s669_s21 = scalar_lea.vmem %s668_s6, 256  ;;  %p670_p7 = scmp.lt.s32.totalorder %s955_s8, %s668_s6 }
  0x59   : > { %p665_p11 = pnand %p663_p9, %p649_p12  ;;  %p671_p4 = scmp.lt.s32.totalorder %s669_s21, %s662_s28 }
  0x5b   : > { %p666_p0 = pneg %p665_p11  ;;  %p672_p13 = por %p671_p4, %p670_p7 }
  0x5d   : > { %p673_p6 = pnand %p672_p13, %p666_p0 }
  0x5f   : > { %676 = shalt.err (!%p673_p6)
}
  0x60   : > { %520 = dma.hbm_to_vmem [thread:$0]  (!%p951_p2), %s947_s7, 128, %s955_s8, %s173_s9  }
  0x61   : > { %193 = sbr.rel (%p853_p8) target bundleno = 467 (0x1d3), region = 32  ;;  %s985_s10 = sand.u32 (!%p853_p8), 1, %s747_s13  }
  0x62   : > { %s461_s11 = sshll.u32 (!%p853_p8), %s985_s10, 3  ;;  %s196_s19 = scalar_lea.sflag (!%p853_p8), [#allocation3], %s985_s10 }
  0x63   : > { %s199_s25 = scalar_lea.vmem (!%p853_p8), [#allocation2], %s461_s11  ;;  %p1073_p7 = scmp.ne.s32.totalorder (!%p853_p8), %s1067_s22, 0 }
  0x68   : > { %730 = dma.done.wait (%p1073_p7), %s196_s19, 128  }
  0x69   : > { %732 = vsyncadd (%p1073_p7), %s196_s19, 4294967168  ;;  %p1074_p12 = scmp.ne.s32.totalorder %s1065_s20, 0 }
  0x6b   : > { %734 = dma.done.wait (%p1074_p12), [#allocation6], 528  }
  0x6c   : > { %736 = vsyncadd (%p1074_p12), [#allocation6], 4294966768  ;;  %v770_v0 = vmov 0.0|0.0   ;;  %vm771_vm0 = vmmov 0   ;;  %v772_v1 = vmov 0.0   ;;  %v231_v2 = vld [vmem:[#allocation5] sm:$0xff] }
  0x6d   : > { %492 = vmatprep.subr.bf16.mxu0 %v770_v0  ;;  %489 = vmatprep.mubr.msk.f32.mxu0 %vm771_vm0, %v772_v1  ;;  %v232_v3 = vld [vmem:[#allocation5 + $0x8] sm:$0xff]  ;;  %v233_v4 = vld [vmem:[#allocation5 + $0x10] sm:$0xff]  ;;  %v234_v6 = vld [vmem:[#allocation5 + $0x18] sm:$0xff]  ;;  %vm242_vm1 = vcmask 261120   ;;  %s464_s20 = sshll.u32 %s985_s10, 5  ;;  %vm316_vm2 = vcmask 64512  }
  0x6e   : > { %v493_v5 = vpack.c.bf16 %v232_v3, %v231_v2  ;;  %v496_v7 = vpack.c.bf16 %v234_v6, %v233_v4  ;;  %v230_v8 = vld [vmem:[%s199_s25] sm:$0xff]  ;;  %v465_v9 = vld [vmem:[#allocation7] ss:$0 sm:$0xff]  ;;  %s773_s22 = smov 104   ;;  %s774_s24 = smov 120  }
  0x6f   : > { %s229_s7 = scalar_lea.vmem [#allocation8], %s464_s20  ;;  %s775_s8 = smov 112  }
  0x70   : > { %494 = vmatpush3.bf16.msra.mxu0 %v493_v5  ;;  %s349_s26 = sshll.u32 %s229_s7, 4  ;;  %s475_s9 = sshll.u32 %s755_s15, 9  ;;  %s1000_s26 = int_to_ptr.vmem [resolvable:$true] %s349_s26 }
  0x71   : > { %495 = vmatprep.subr.bf16.mxu0 %v770_v0  ;;  %s1007_s28 = scalar_lea.hbm %s1060_s3, %s475_s9  ;;  %s335_s15 = scalar_lea.sflag [#allocation4], %s985_s10 }
  0x72   : > { %s677_s5 = scalar_lea.vmem %s1000_s26, 512  ;;  %p1075_p2 = scmp.ne.s32.totalorder %s1071_s27, 0 }
  0x73   : > { %p678_p8 = scmp.ne.s32.totalorder %s1000_s26, %s677_s5  ;;  %s776_s6 = smov [#allocation8]  }
  0x74   : > { %497 = vmatpush3.bf16.msra.mxu0 %v496_v7  ;;  %s681_s21 = sshll.u32 %s776_s6, 4  ;;  %s682_s21 = int_to_ptr.vmem [resolvable:$false] %s681_s21 }
  0x75   : > { %p679_p1 = pnand %p678_p8, %p1075_p2  ;;  %s683_s11 = scalar_lea.vmem %s682_s21, 1024 }
  0x76   : > { %p684_p3 = scmp.lt.s32.totalorder %s1000_s26, %s682_s21  ;;  %p685_p5 = scmp.lt.s32.totalorder %s683_s11, %s677_s5 }
  0x77   : > { %490 = vmatmul.mubr.msk.f32.vlgmr.msra.gmra.mrb[0].mxu0 %vm242_vm1, %v230_v8  ;;  %p680_p10 = pneg %p679_p1 }
  0x78   : > { %p686_p9 = por %p685_p5, %p684_p3 }
  0x7a   : > { %p687_p11 = pnand %p686_p9, %p680_p10 }
 0x14a   : > { %v312_v10 = vpop.f32.mrb[0].mxu0 }
 0x14b   : > { %v313_v11 = vadd.f32 %v465_v9, %v312_v10  ;;  %v491_v12 = vpop.f32.mrb[1].mxu0 }
 0x14d   : > { %329 = vrot.lane.b32.xlu1 %v313_v11, %s773_s22  ;;  %319 = vrot.lane.b32.xlu0 %v313_v11, %s774_s24  ;;  %317 = vst.msk [vmem:[%s229_s7] sm:$0xff] %vm316_vm2, %v313_v11 }
 0x151   : > { %324 = vrot.lane.b32.xlu0 %v313_v11, %s775_s8 }
 0x1bf   : > { %v330_v13 = vpop.permute.xlu1 %329  ;;  %v320_v14 = vpop.permute.xlu0 %319 }
 0x1c0   : > { %469 = vst.msk [vmem:[%s229_s7 + $0x18] sm:$0xff] %vm316_vm2, %v330_v13  ;;  %467 = vst.msk [vmem:[%s229_s7 + $0x8] sm:$0xff] %vm316_vm2, %v320_v14 }
 0x1c3   : > { %v325_v15 = vpop.permute.xlu0 %324 }
 0x1c4   : > { %468 = vst.msk [vmem:[%s229_s7 + $0x10] sm:$0xff] %vm316_vm2, %v325_v15 }
 0x1c5   : > { %690 = shalt.err (!%p687_p11)
}
 0x1c6   : > { %s691_s19 = scalar_lea.hbm %s1007_s28, 512  ;;  %s695_s22 = scalar_lea.hbm %s1060_s3, 1024 }
 0x1c7   : > { %p692_p0 = scmp.ne.s32.totalorder %s1007_s28, %s691_s19  ;;  %p696_p6 = scmp.lt.u32.totalorder %s1007_s28, %s1060_s3 }
 0x1c8   : > { %p697_p7 = scmp.lt.u32.totalorder %s695_s22, %s691_s19  ;;  %p699_p8 = scmp.lt.u32.totalorder %s691_s19, %s1007_s28 }
 0x1c9   : > { %p693_p4 = pnand %p692_p0, %p1075_p2 }
 0x1ca   : > { %p698_p12 = por %p697_p7, %p696_p6 }
 0x1cb   : > { %p694_p13 = pneg %p693_p4 }
 0x1cc   : > { %p700_p1 = por %p699_p8, %p698_p12 }
 0x1ce   : > { %p701_p10 = pnand %p700_p1, %p694_p13 }
 0x1d0   : > { %704 = shalt.err (!%p701_p10)
}
 0x1d1   : > { %s777_s8 = smov 128   ;;  %s778_s9 = smov 8  }
 0x1d2   : > { %508 = dma.vmem_to_hbm [thread:$0]  (%p1075_p2), %s1000_s26, 512, %s1007_s28, %s335_s15, %s777_s8, %s777_s8, %s778_s9  }
 0x1d3 PF: > { %s364_s29 = sand.u32 1, %s743_s12   ;;  %p1076_p3 = scmp.ne.s32.totalorder %s1068_s23, 0 }
 0x1d4   : > { %p1077_p5 = scmp.ge.s32.totalorder %s763_s17, 2  ;;  %s365_s30 = scalar_lea.sflag [#allocation4], %s364_s29 }
 0x1d6   : > { %p522_p9 = pnand %p1077_p5, %p1076_p3 }
 0x1d8   : > { %738 = dma.done.wait (!%p522_p9), %s365_s30, 512  }
 0x1d9   : > { %740 = vsyncadd (!%p522_p9), %s365_s30, 4294966784  ;;  %s20_s17 = sadd.s32 1, %s763_s17   ;;  %s1078_s12 = smov %s747_s13 }
 0x1da   : > { %p17_p11 = scmp.ge.s32.totalorder %s20_s17, 4   ;;  %s1079_s13 = smov %s751_s14 }
 0x1db   : > { %s1080_s14 = smov %s942_s4  ;;  %s1081_s15 = smov %s759_s16 }
 0x1dc   : > { %s1082_s16 = smov %s1084_s18  ;;  %19 = sbr.rel (!%p17_p11) target bundleno = 7 (0x7), region = 88 }
 0x1e3   :  { %370 = vsyncpa [#allocation3], 1 }
 0x1e4   :  { %372 = vsyncpa [#allocation3 + $0x1], 1 }
 0x1e5   :  { %373 = vsyncpa [#allocation6], 1 }
 0x1e6   :  { %374 = vsyncpa [#allocation4], 1 }
 0x1e7   :  { %376 = vsyncpa [#allocation4 + $0x1], 1 }

</bundles_post_ra>
